<compile_context>
chip_gen: v7x
topology: tpu7x:2x2x1
jax: 0.10.0
libtpu: 0.0.40
codegen_flags: <defaults>
</compile_context>

<pallas_src>
import functools

import jax
import jax.numpy as jnp
from jax.experimental import pallas as pl
from jax.experimental.pallas import tpu as pltpu


def _mlp_kernel(x_ref, w1_ref, b1_ref, w2_ref, b2_ref, o_ref):
    """One batch tile of the forward pass (hidden activation kept lane-dense).

    x_ref  : (TILE_B, D)  f32  VMEM (streamed per grid step)
    w1_ref : (H, D)       f32  VMEM (resident; PyTorch nn.Linear layout)
    b1_ref : (H, 1)       f32  VMEM (resident)
    w2_ref : (1, H)       f32  VMEM (resident; PyTorch nn.Linear layout)
    b2_ref : (1,)         f32  SMEM scalar
    o_ref  : (1, TILE_B)  f32  VMEM (lane-dense output row)
    """
    # Linear 1 on the MXU: contract D -> h is (H, TILE_B), batch on the
    # 128-lane axis.  f32 accumulation; exact parity with the PyTorch module.
    h = jax.lax.dot_general(
        w1_ref[...], x_ref[...],
        dimension_numbers=(((1,), (1,)), ((), ())),
        preferred_element_type=jnp.float32)                  # (H, TILE_B)

    # Bias + ReLU on the VPU, lane-dense layout.
    h = jnp.maximum(h + b1_ref[...], 0.0)

    # Linear 2 (out_features = 1): plain (1, H) @ (H, TILE_B) contraction; the
    # result is directly the lane-dense (1, TILE_B) output row.
    y = jnp.dot(w2_ref[...], h, preferred_element_type=jnp.float32)
    y = y + b2_ref[0]

    o_ref[...] = jax.nn.sigmoid(y).astype(o_ref.dtype)       # Sigmoid (EUP)


def _round_up(n, m):
    return ((n + m - 1) // m) * m


@functools.partial(jax.jit, static_argnames=("tile_b",))
def neural_net_forward(x, w1, b1, w2, b2, tile_b=4096):
    """Pallas forward for NeuralNet.

    x  : (B, D) f32
    w1 : (H, D) f32   (PyTorch nn.Linear layout: [out_features, in_features])
    b1 : (H,)   f32
    w2 : (1, H) f32
    b2 : (1,)   f32
    returns (B, 1) f32
    """
    B, D = x.shape
    H = w1.shape[0]

    # Layout plumbing on the tiny parameters only; no extra HBM pass over x.
    x_f = jnp.asarray(x, jnp.float32)
    w1_f = jnp.asarray(w1, jnp.float32)
    b1_col = jnp.asarray(b1, jnp.float32).reshape(H, 1)
    w2_row = jnp.asarray(w2, jnp.float32).reshape(1, H)
    b2_s = jnp.asarray(b2, jnp.float32).reshape(1)

    # Tile selection:
    #  * single-block fast path when the batch fits one tile (one grid step,
    #    no padding at all);
    #  * otherwise tiles are a multiple of 128 (unmasked lane-dense output
    #    stores) and the grid has >= 2 steps so both v7x TensorCores get work.
    #  x is never padded in the wrapper; the partial edge block is handled by
    #  Pallas (masked output store on the last block only).
    if B <= tile_b:
        tile = B
        grid_b = 1
    else:
        half = _round_up(pl.cdiv(B, 2), 128)
        tile = max(128, min((tile_b // 128) * 128, half))
        grid_b = pl.cdiv(B, tile)

    cost = pl.CostEstimate(
        flops=2 * B * D * H + 2 * B * H,
        transcendentals=B,
        bytes_accessed=(B * D + H * D + H + H + 1 + B) * 4,
    )

    out = pl.pallas_call(
        _mlp_kernel,
        # Lane-dense output slab: batch lives on the 128-lane axis.
        out_shape=jax.ShapeDtypeStruct((1, B), jnp.float32),
        grid=(grid_b,),
        in_specs=[
            pl.BlockSpec((tile, D), lambda i: (i, 0)),          # x: streamed
            pl.BlockSpec((H, D), lambda i: (0, 0)),             # w1: resident
            pl.BlockSpec((H, 1), lambda i: (0, 0)),             # b1: resident
            pl.BlockSpec((1, H), lambda i: (0, 0)),             # w2: resident
            pl.BlockSpec(memory_space=pltpu.MemorySpace.SMEM),  # b2: scalar
        ],
        out_specs=pl.BlockSpec((1, tile), lambda i: (0, i)),
        compiler_params=pltpu.CompilerParams(
            dimension_semantics=("parallel",),   # batch axis -> 2 TCs on v7x
        ),
        cost_estimate=cost,
    )(x_f, w1_f, b1_col, w2_row, b2_s)

    # Back to the PyTorch output shape (B, 1).
    return out.reshape(B, 1)


def init_params(key, input_size, hidden_size):
    """Deterministic init matching nn.Linear (uniform +-1/sqrt(fan_in)).

    Weights are kept in PyTorch layout: w1 is [hidden, in], w2 is [1, hidden]."""
    k1, k2, k3, k4 = jax.random.split(key, 4)
    bound1 = 1.0 / jnp.sqrt(input_size)
    bound2 = 1.0 / jnp.sqrt(hidden_size)
    w1 = jax.random.uniform(k1, (hidden_size, input_size), jnp.float32,
                            -bound1, bound1)
    b1 = jax.random.uniform(k2, (hidden_size,), jnp.float32, -bound1, bound1)
    w2 = jax.random.uniform(k3, (1, hidden_size), jnp.float32, -bound2, bound2)
    b2 = jax.random.uniform(k4, (1,), jnp.float32, -bound2, bound2)
    return w1, b1, w2, b2


if __name__ == "__main__":
    input_size = 16
    hidden_size = 32
    batch = 300

    key = jax.random.PRNGKey(0)
    kx, kp = jax.random.split(key)
    x = jax.random.normal(kx, (batch, input_size), jnp.float32)
    w1, b1, w2, b2 = init_params(kp, input_size, hidden_size)

    # Default config: single-block fast path (grid=(1,)).
    out = neural_net_forward(x, w1, b1, w2, b2)
    out = jax.block_until_ready(out)
    assert out.shape == (batch, 1)

    # Small-tile config: exercises the multi-step grid and the partial edge
    # block (300 = 2*128 + 44) with no wrapper-side padding.
    out_tiled = jax.block_until_ready(
        neural_net_forward(x, w1, b1, w2, b2, tile_b=128))

    # Full-f32 PyTorch-equivalent reference.
    ref = jax.nn.sigmoid(
        jnp.maximum(x @ w1.T + b1[None, :], 0.0) @ w2.T + b2[None, :])
    assert ref.shape == (batch, 1)
    assert jnp.allclose(out, ref, atol=1e-5, rtol=1e-5)
    assert jnp.allclose(out_tiled, ref, atol=1e-5, rtol=1e-5)

    print("KERNEL_OK")
</pallas_src>

<mosaic_0001>
module attributes {stable_mosaic.version = 11 : i64} {
  func.func @_mlp_kernel(%arg0: i32, %arg1: memref<300x16xf32, #tpu.memory_space<vmem>>, %arg2: memref<32x16xf32, #tpu.memory_space<vmem>>, %arg3: memref<32x1xf32, #tpu.memory_space<vmem>>, %arg4: memref<1x32xf32, #tpu.memory_space<vmem>>, %arg5: memref<1xf32, #tpu.memory_space<smem>>, %arg6: memref<1x300xf32, #tpu.memory_space<vmem>>) attributes {dimension_semantics = [#tpu.dimension_semantics<parallel>], iteration_bounds = array<i64: 1>, scalar_prefetch = 0 : i64, scratch_operands = 0 : i64, tpu.core_type = #tpu.core_type<tc>, window_params = [{transform_indices = @transform_0, window_bounds = array<i64: 300, 16>}, {pipeline_mode = #tpu.pipeline_mode<synchronous>, transform_indices = @transform_1, window_bounds = array<i64: 32, 16>}, {pipeline_mode = #tpu.pipeline_mode<synchronous>, transform_indices = @transform_2, window_bounds = array<i64: 32, 1>}, {pipeline_mode = #tpu.pipeline_mode<synchronous>, transform_indices = @transform_3, window_bounds = array<i64: 1, 32>}, {transform_indices = @transform_4, window_bounds = array<i64: 1>}, {transform_indices = @transform_5, window_bounds = array<i64: 1, 300>}]} {
    %c0 = arith.constant 0 : index
    %c0_0 = arith.constant 0 : index
    %0 = vector.load %arg2[%c0, %c0_0] : memref<32x16xf32, #tpu.memory_space<vmem>>, vector<32x16xf32>
    %c0_1 = arith.constant 0 : index
    %c0_2 = arith.constant 0 : index
    %1 = vector.load %arg1[%c0_1, %c0_2] : memref<300x16xf32, #tpu.memory_space<vmem>>, vector<300x16xf32>
    %cst = arith.constant dense<0.000000e+00> : vector<32x300xf32>
    %2 = tpu.matmul %0, %1, %cst {dimension_numbers = #tpu.dot_dimension_numbers<[1], [1], [0], [0], [0, 0, 1, 0], [], []>} : vector<32x16xf32>, vector<300x16xf32>, vector<32x300xf32> -> vector<32x300xf32>
    %c0_3 = arith.constant 0 : index
    %c0_4 = arith.constant 0 : index
    %3 = vector.load %arg3[%c0_3, %c0_4] : memref<32x1xf32, #tpu.memory_space<vmem>>, vector<32x1xf32>
    %4 = vector.broadcast %3 : vector<32x1xf32> to vector<32x300xf32>
    %5 = arith.addf %2, %4 : vector<32x300xf32>
    %cst_5 = arith.constant 0.000000e+00 : f32
    %6 = vector.broadcast %cst_5 : f32 to vector<32x300xf32>
    %7 = arith.maximumf %5, %6 : vector<32x300xf32>
    %c0_6 = arith.constant 0 : index
    %c0_7 = arith.constant 0 : index
    %8 = vector.load %arg4[%c0_6, %c0_7] : memref<1x32xf32, #tpu.memory_space<vmem>>, vector<1x32xf32>
    %cst_8 = arith.constant dense<0.000000e+00> : vector<1x300xf32>
    %9 = tpu.matmul %8, %7, %cst_8 {dimension_numbers = #tpu.dot_dimension_numbers<[1], [0], [0], [1], [0, 0, 1, 1], [], []>} : vector<1x32xf32>, vector<32x300xf32>, vector<1x300xf32> -> vector<1x300xf32>
    %c0_9 = arith.constant 0 : index
    %10 = memref.load %arg5[%c0_9] : memref<1xf32, #tpu.memory_space<smem>>
    %11 = vector.broadcast %10 : f32 to vector<1x300xf32>
    %12 = arith.addf %9, %11 : vector<1x300xf32>
    %13 = arith.negf %12 : vector<1x300xf32>
    %14 = math.exp %13 : vector<1x300xf32>
    %cst_10 = arith.constant 1.000000e+00 : f32
    %15 = vector.broadcast %cst_10 : f32 to vector<1x300xf32>
    %16 = arith.addf %15, %14 : vector<1x300xf32>
    %17 = arith.divf %15, %16 : vector<1x300xf32>
    %c0_11 = arith.constant 0 : index
    %c0_12 = arith.constant 0 : index
    %18 = vector.load %arg6[%c0_11, %c0_12] : memref<1x300xf32, #tpu.memory_space<vmem>>, vector<1x300xf32>
    tpu.vector_store %arg6[%c0_11, %c0_12], %17 {strides = array<i32>} : memref<1x300xf32, #tpu.memory_space<vmem>>, vector<1x300xf32>,
    return
  }
  func.func @transform_0(%arg0: i32) -> (i32, i32) {
    %c0_i32 = arith.constant 0 : i32
    %c0_i32_0 = arith.constant 0 : i32
    return %arg0, %c0_i32 : i32, i32
  }
  func.func @transform_1(%arg0: i32) -> (i32, i32) {
    %c0_i32 = arith.constant 0 : i32
    %c0_i32_0 = arith.constant 0 : i32
    %c0_i32_1 = arith.constant 0 : i32
    return %c0_i32, %c0_i32_0 : i32, i32
  }
  func.func @transform_2(%arg0: i32) -> (i32, i32) {
    %c0_i32 = arith.constant 0 : i32
    %c0_i32_0 = arith.constant 0 : i32
    %c0_i32_1 = arith.constant 0 : i32
    return %c0_i32, %c0_i32_0 : i32, i32
  }
  func.func @transform_3(%arg0: i32) -> (i32, i32) {
    %c0_i32 = arith.constant 0 : i32
    %c0_i32_0 = arith.constant 0 : i32
    %c0_i32_1 = arith.constant 0 : i32
    return %c0_i32, %c0_i32_0 : i32, i32
  }
  func.func @transform_4(%arg0: i32) -> i32 {
    %c0_i32 = arith.constant 0 : i32
    %c0_i32_0 = arith.constant 0 : i32
    return %c0_i32 : i32
  }
  func.func @transform_5(%arg0: i32) -> (i32, i32) {
    %c0_i32 = arith.constant 0 : i32
    %c0_i32_0 = arith.constant 0 : i32
    return %c0_i32, %arg0 : i32, i32
  }
}

</mosaic_0001>

<bundles_post_ra>
// kernel: neural_net_forward.1
= control target key start
LH: loop header
LB: loop body
LE: loop exit
PB: predicated region body
PF: predicated region fallthrough
CT: control target
= control target key end

     0   :  { %vm88_vm0 = vcmask 130048   ;;  %v872_v7 = vmov 0   ;;  %s1131_s0 = inlined_call_operand.vmem [shape: f32[300,16], index: 0, kind: input, shape index: {}]   ;;  %s1132_s1 = inlined_call_operand.vmem [shape: f32[32,16], index: 1, kind: input, shape index: {}]   ;;  %s1133_s2 = inlined_call_operand.vmem [shape: f32[32,1], index: 2, kind: input, shape index: {}]   ;;  %s1134_s3 = inlined_call_operand.vmem [shape: f32[1,32], index: 3, kind: input, shape index: {}]   ;;  %s1135_s4 = inlined_call_operand.<no memory space> [shape: f32[1], index: 4, kind: input, shape index: {}]   ;;  %s1136_s5 = inlined_call_operand.hbm [shape: f32[1,300], index: 5, kind: output, shape index: {}]  }
   0x1   :  { %v42_v0 = vld [vmem:[%s1131_s0 + $0x80] sm:$0xff]  ;;  %v43_v1 = vld [vmem:[%s1131_s0 + $0x88] sm:$0xff]  ;;  %vm919_vm1 = vmpackc.low %vm88_vm0, %vm88_vm0  ;;  %834 = vset.pattern.permute.xlu0 %v872_v7  ;;  %835 = vset.pattern.permute.xlu1 %v872_v7 }
   0x2   :  { %v26_v2 = vld [vmem:[%s1131_s0] sm:$0xff]  ;;  %v748_v3 = vpack.c.bf16 %v43_v1, %v42_v0  ;;  %v27_v5 = vld [vmem:[%s1131_s0 + $0x8] sm:$0xff]  ;;  %v44_v6 = vld [vmem:[%s1131_s0 + $0x90] sm:$0xff] }
   0x3   :  { %v751_v8 = vpack.c.bf16 %v27_v5, %v26_v2  ;;  %v45_v9 = vld [vmem:[%s1131_s0 + $0x98] sm:$0xff]  ;;  %v28_v11 = vld [vmem:[%s1131_s0 + $0x10] sm:$0xff]  ;;  %v46_v13 = vld [vmem:[%s1131_s0 + $0xa0] sm:$0xff] }
   0x4   :  { %750 = vmatprep.subr.msk.bf16.mxu0 %vm919_vm1, %v748_v3  ;;  %v754_v10 = vpack.c.bf16 %v45_v9, %v44_v6  ;;  %v29_v12 = vld [vmem:[%s1131_s0 + $0x18] sm:$0xff]  ;;  %v47_v14 = vld [vmem:[%s1131_s0 + $0xa8] sm:$0xff]  ;;  %v58_v16 = vld [vmem:[%s1131_s0 + $0x100] sm:$0xff] }
   0x5   :  { %753 = vmatpush3.bf16.xpose.msk.msra.mxu0 %vm919_vm1, %v751_v8  ;;  %v757_v15 = vpack.c.bf16 %v29_v12, %v28_v11  ;;  %v59_v17 = vld [vmem:[%s1131_s0 + $0x108] sm:$0xff]  ;;  %v760_v18 = vpack.c.bf16 %v47_v14, %v46_v13  ;;  %v60_v20 = vld [vmem:[%s1131_s0 + $0x110] sm:$0xff]  ;;  %v61_v21 = vld [vmem:[%s1131_s0 + $0x118] sm:$0xff] }
   0x6   :  { %756 = vmatprep.subr.msk.bf16.mxu0 %vm919_vm1, %v754_v10  ;;  %v796_v19 = vpack.c.bf16 %v59_v17, %v58_v16  ;;  %v802_v22 = vpack.c.bf16 %v61_v21, %v60_v20  ;;  %v30_v23 = vld [vmem:[%s1131_s0 + $0x20] sm:$0xff]  ;;  %v31_v24 = vld [vmem:[%s1131_s0 + $0x28] sm:$0xff]  ;;  %v48_v25 = vld [vmem:[%s1131_s0 + $0xb0] sm:$0xff] }
   0x7   :  { %v49_v26 = vld [vmem:[%s1131_s0 + $0xb8] sm:$0xff]  ;;  %v987_v27 = vld [vmem:[%s1132_s1] sm:$0xff]  ;;  %v63_v29 = vld [vmem:[%s1131_s0 + $0x128] sm:$0xf] }
   0x8   :  { %798 = vmatprep.subr.msk.bf16.mxu1 %vm919_vm1, %v796_v19  ;;  %v62_v28 = vld [vmem:[%s1131_s0 + $0x120] sm:$0xff]  ;;  %696 = vmatprep.mubr.msk.f32.mxu0 %vm88_vm0, %v987_v27  ;;  %v66_v31 = vld [vmem:[%s1133_s2 + $0x10] sm:$0xff] }
   0x9   :  { %801 = vmatpush3.bf16.xpose.msk.msra.mxu1 %vm919_vm1, %v796_v19  ;;  %731 = vmatprep.mubr.msk.f32.mxu1 %vm88_vm0, %v987_v27  ;;  %v64_v30 = vld [vmem:[%s1133_s2] sm:$0xff] }
   0xa   :  { %804 = vmatprep.subr.msk.bf16.mxu1 %vm919_vm1, %v802_v22  ;;  %70 = vperm.xlu0 %834, %v64_v30  }
   0xd   :  { %759 = vmatpush3.bf16.xpose.msk.msra.mxu0 %vm919_vm1, %v757_v15 }
   0xe   :  { %762 = vmatprep.subr.msk.bf16.mxu0 %vm919_vm1, %v760_v18 }
   0xf   :  { %11 = vsyncpa [#allocation4], 0  ;;  %v763_v32 = vpack.c.bf16 %v31_v24, %v30_v23  ;;  %v65_v33 = vld [vmem:[%s1133_s2 + $0x8] sm:$0xff]  ;;  %80 = vperm.xlu1 %835, %v66_v31   ;;  %v766_v34 = vpack.c.bf16 %v49_v26, %v48_v25  ;;  %v808_v35 = vpack.c.bf16 %v63_v29, %v62_v28  ;;  %v67_v36 = vld [vmem:[%s1133_s2 + $0x18] sm:$0xff]  ;;  %v873_v3 = vmov 0.0  }
  0x10   :  { %75 = vperm.xlu0 %834, %v65_v33   ;;  %v32_v37 = vld [vmem:[%s1131_s0 + $0x30] sm:$0xff]  ;;  %v33_v38 = vld [vmem:[%s1131_s0 + $0x38] sm:$0xff]  ;;  %v50_v39 = vld [vmem:[%s1131_s0 + $0xc0] sm:$0xff]  ;;  %vm404_vm2 = vcmask 261120   ;;  %vm875_vm3 = vmmov 0  }
  0x11   :  { %807 = vmatpush3.bf16.xpose.msk.msra.mxu1 %vm919_vm1, %v802_v22  ;;  %v51_v40 = vld [vmem:[%s1131_s0 + $0xc8] sm:$0xff]  ;;  %v769_v41 = vpack.c.bf16 %v33_v38, %v32_v37  ;;  %v34_v43 = vld [vmem:[%s1131_s0 + $0x40] sm:$0xff]  ;;  %v52_v45 = vld [vmem:[%s1131_s0 + $0xd0] sm:$0xff] }
  0x12   :  { %810 = vmatprep.subr.msk.bf16.mxu1 %vm919_vm1, %v808_v35  ;;  %v772_v42 = vpack.c.bf16 %v51_v40, %v50_v39  ;;  %v35_v44 = vld [vmem:[%s1131_s0 + $0x48] sm:$0xff]  ;;  %v53_v46 = vld [vmem:[%s1131_s0 + $0xd8] sm:$0xff]  ;;  %v24_v50 = vld [vmem:[%s1132_s1 + $0x10] sm:$0xff] }
  0x13   :  { %85 = vperm.xlu1 %835, %v67_v36   ;;  %v775_v47 = vpack.c.bf16 %v35_v44, %v34_v43  ;;  %v23_v48 = vld [vmem:[%s1132_s1 + $0x8] sm:$0xff]  ;;  %v778_v49 = vpack.c.bf16 %v53_v46, %v52_v45  ;;  %v25_v51 = vld [vmem:[%s1132_s1 + $0x18] sm:$0xff]  ;;  %v36_v52 = vld [vmem:[%s1131_s0 + $0x50] sm:$0xff] }
  0x14   :  { %v37_v53 = vld [vmem:[%s1131_s0 + $0x58] sm:$0xff]  ;;  %v54_v54 = vld [vmem:[%s1131_s0 + $0xe0] sm:$0xff]  ;;  %v55_v55 = vld [vmem:[%s1131_s0 + $0xe8] sm:$0xff] }
  0x15   :  { %765 = vmatpush3.bf16.xpose.msk.msra.mxu0 %vm919_vm1, %v763_v32  ;;  %v781_v56 = vpack.c.bf16 %v37_v53, %v36_v52  ;;  %v784_v57 = vpack.c.bf16 %v55_v55, %v54_v54  ;;  %v38_v58 = vld [vmem:[%s1131_s0 + $0x60] sm:$0xff]  ;;  %v39_v59 = vld [vmem:[%s1131_s0 + $0x68] sm:$0xff]  ;;  %v56_v60 = vld [vmem:[%s1131_s0 + $0xf0] sm:$0xff]  ;;  %v403_v52 = vstv %s1135_s4 }
  0x16   :  { %768 = vmatprep.subr.msk.bf16.mxu0 %vm919_vm1, %v766_v34  ;;  %v57_v61 = vld [vmem:[%s1131_s0 + $0xf8] sm:$0xff]  ;;  %v787_v62 = vpack.c.bf16 %v39_v59, %v38_v58  ;;  %v40_v0 = vld [vmem:[%s1131_s0 + $0x70] sm:$0xff] }
  0x17   :  { %v790_v63 = vpack.c.bf16 %v57_v61, %v56_v60  ;;  %v41_v1 = vld [vmem:[%s1131_s0 + $0x78] sm:$0xff] }
  0x18   :  { %v793_v2 = vpack.c.bf16 %v41_v1, %v40_v0 }
  0x19   :  { %813 = vmatpush3.bf16.xpose.msk.msra.mxu1 %vm919_vm1, %v808_v35 }
  0x1d   :  { %771 = vmatpush3.bf16.xpose.msk.msra.mxu0 %vm919_vm1, %v769_v41 }
  0x1e   :  { %774 = vmatprep.subr.msk.bf16.mxu0 %vm919_vm1, %v772_v42 }
  0x20   :  { %732 = vmatmul.mubr.msk.f32.vlgmr.msra.gmra.mrb[0].mxu1 %vm88_vm0, %v23_v48 }
  0x21   :  { %734 = vmatprep.mubr.msk.f32.mxu1 %vm88_vm0, %v24_v50 }
  0x24   :  { %735 = vmatmul.mubr.msk.f32.gmra.mrb[2].mxu1 %vm88_vm0, %v25_v51 }
  0x25   :  { %777 = vmatpush3.bf16.xpose.msk.msra.mxu0 %vm919_vm1, %v775_v47  ;;  %472 = vmatprep.mubr.f32.mxu1 %v873_v3 }
  0x26   :  { %780 = vmatprep.subr.msk.bf16.mxu0 %vm919_vm1, %v778_v49 }
  0x2d   :  { %783 = vmatpush3.bf16.xpose.msk.msra.mxu0 %vm919_vm1, %v781_v56 }
  0x2e   :  { %786 = vmatprep.subr.msk.bf16.mxu0 %vm919_vm1, %v784_v57 }
  0x35   :  { %789 = vmatpush3.bf16.xpose.msk.msra.mxu0 %vm919_vm1, %v787_v62 }
  0x36   :  { %792 = vmatprep.subr.msk.bf16.mxu0 %vm919_vm1, %v790_v63 }
  0x3d   :  { %795 = vmatpush3.bf16.xpose.msk.msra.mxu0 %vm919_vm1, %v793_v2 }
  0x44   :  { %697 = vmatmul.mubr.msk.f32.vlgmr.msra.gmra.mrb[0].mxu0 %vm88_vm0, %v987_v27 }
  0x45   :  { %698 = vmatprep.mubr.msk.f32.mxu0 %vm88_vm0, %v23_v48 }
  0x48   :  { %699 = vmatmul.mubr.msk.f32.gmra.mrb[2].mxu0 %vm88_vm0, %v23_v48 }
  0x49   :  { %700 = vmatprep.mubr.msk.f32.mxu0 %vm88_vm0, %v24_v50 }
  0x4c   :  { %701 = vmatmul.mubr.msk.f32.gmra.mrb[4].mxu0 %vm88_vm0, %v24_v50  ;;  %v401_v50 = vld [vmem:[%s1134_s3] sm:$0x1]  ;;  %s877_s3 = smov [#allocation3]  }
  0x4d   :  { %702 = vmatprep.mubr.msk.f32.mxu0 %vm88_vm0, %v25_v51  ;;  %s605_s4 = sshll.u32 %s877_s3, 4  ;;  %s606_s4 = int_to_ptr.vmem [resolvable:$true] %s605_s4 }
  0x4e   :  { %s848_s10 = scalar_lea.vmem %s606_s4, 48  ;;  %s852_s11 = scalar_lea.vmem %s606_s4, 64 }
  0x4f   :  { %p849_p0 = scmp.ne.s32.totalorder %s606_s4, %s848_s10  ;;  %p853_p1 = scmp.lt.s32.totalorder %s606_s4, %s606_s4 }
  0x50   :  { %703 = vmatmul.mubr.msk.f32.gmra.mrb[6].mxu0 %vm88_vm0, %v25_v51  ;;  %v874_v51 = vmov 0.0|0.0   ;;  %p854_p2 = scmp.lt.s32.totalorder %s852_s11, %s848_s10 }
  0x52   :  { %p855_p3 = por %p854_p2, %p853_p1 }
  0x54   :  { %p856_p4 = pnand %p855_p3, %p849_p0 }
  0x89   :  { %v71_v5 = vpop.permute.xlu0 %70 }
  0x8e   :  { %v81_v4 = vpop.permute.xlu1 %80 }
  0x8f   :  { %v76_v6 = vpop.permute.xlu0 %75 }
  0x92   :  { %v86_v11 = vpop.permute.xlu1 %85 }
  0xf3   :  { %v733_v7 = vpop.f32.mrb[0].mxu1 }
  0xf4   :  { %v376_v8 = vadd.f32 %v733_v7, %v76_v6  ;;  %v370_v9 = vpop.f32.mrb[1].mxu1  ;;  %v574_v7 = vlaneseq }
  0xf5   :  { %v371_v10 = vadd.f32 %v370_v9, %v71_v5 }
  0xf6   :  { %v394_v12 = vmax.f32 %v376_v8, 0.0  ;;  %vm596_vm4 = vcmp.lt.s32.totalorder %v574_v7, 300 }
  0xf7   :  { %v391_v13 = vmax.f32 %v371_v10, 0.0  ;;  %v736_v14 = vpop.f32.mrb[2].mxu1 }
  0xf8   :  { %v386_v15 = vadd.f32 %v736_v14, %v86_v11  ;;  %v380_v16 = vpop.f32.mrb[3].mxu1 }
  0xf9   :  { %v823_v17 = vpack.c.bf16 %v394_v12, %v391_v13  ;;  %v381_v18 = vadd.f32 %v380_v16, %v81_v4 }
  0xfa   :  { %v400_v19 = vmax.f32 %v386_v15, 0.0 }
  0xfb   :  { %v397_v20 = vmax.f32 %v381_v18, 0.0 }
  0xfd   :  { %v826_v21 = vpack.c.bf16 %v400_v19, %v397_v20 }
 0x117   :  { %v281_v22 = vpop.f32.mrb[0].mxu0 }
 0x118   :  { %v283_v23 = vpop.f32.mrb[1].mxu0  ;;  %v282_v24 = vadd.f32 %v281_v22, %v71_v5 }
 0x119   :  { %v284_v25 = vadd.f32 %v283_v23, %v71_v5 }
 0x11a   :  { %v389_v30 = vmax.f32 %v282_v24, 0.0 }
 0x11b   :  { %v287_v26 = vpop.f32.mrb[2].mxu0  ;;  %v390_v32 = vmax.f32 %v284_v25, 0.0 }
 0x11c   :  { %v288_v27 = vadd.f32 %v287_v26, %v76_v6  ;;  %v289_v28 = vpop.f32.mrb[3].mxu0 }
 0x11d   :  { %v290_v29 = vadd.f32 %v289_v28, %v76_v6 }
 0x11e   :  { %v392_v31 = vmax.f32 %v288_v27, 0.0 }
 0x11f   :  { %v393_v33 = vmax.f32 %v290_v29, 0.0  ;;  %v293_v34 = vpop.f32.mrb[4].mxu0 }
 0x120   :  { %v816_v35 = vpack.c.bf16 %v392_v31, %v389_v30  ;;  %v295_v36 = vpop.f32.mrb[5].mxu0  ;;  %v294_v38 = vadd.f32 %v293_v34, %v81_v4 }
 0x121   :  { %v814_v37 = vpack.c.bf16 %v393_v33, %v390_v32  ;;  %v296_v39 = vadd.f32 %v295_v36, %v81_v4  ;;  %v876_v4 = vmov 1966171168  }
 0x122   :  { %v395_v44 = vmax.f32 %v294_v38, 0.0  ;;  %v572_v6 = vunpack.c.l.s4 %v876_v4 }
 0x123   :  { %v299_v40 = vpop.f32.mrb[6].mxu0  ;;  %815 = vmatprep.subr.bf16.mxu1 %v814_v37  ;;  %v396_v46 = vmax.f32 %v296_v39, 0.0 }
 0x124   :  { %v300_v41 = vadd.f32 %v299_v40, %v86_v11  ;;  %v301_v42 = vpop.f32.mrb[7].mxu0  ;;  %817 = vmatpush1.bf16.msra.mxu1 %v816_v35  ;;  %v573_v10 = vunpack.c.0.s8 %v572_v6 }
 0x125   :  { %v302_v43 = vadd.f32 %v301_v42, %v86_v11  ;;  %v575_v11 = vshrl.u32 %v574_v7, 7 }
 0x126   :  { %v398_v45 = vmax.f32 %v300_v41, 0.0 }
 0x127   :  { %v399_v47 = vmax.f32 %v302_v43, 0.0  ;;  %v576_v13 = vsub.s32 %v573_v10, %v575_v11 }
 0x128   :  { %v820_v48 = vpack.c.bf16 %v398_v45, %v395_v44 }
 0x129   :  { %v818_v49 = vpack.c.bf16 %v399_v47, %v396_v46 }
 0x12b   :  { %819 = vmatprep.subr.bf16.mxu1 %v818_v49 }
 0x12c   :  { %821 = vmatpush1.bf16.msra.mxu1 %v820_v48 }
 0x12d   :  { %822 = vmatprep.subr.bf16.mxu1 %v874_v51 }
 0x12f   :  { %659 = vmatmul.mubr.msk.f32.vlgmr.msra.gmra.mrb[4].mxu1 %vm404_vm2, %v401_v50 }
 0x130   :  { %824 = vmatpush3.bf16.msra.mxu1 %v823_v17  ;;  %745 = vmatprep.mubr.msk.f32.mxu1 %vm875_vm3, %v873_v3 }
 0x131   :  { %825 = vmatprep.subr.bf16.mxu1 %v874_v51 }
 0x134   :  { %827 = vmatpush3.bf16.msra.mxu1 %v826_v21 }
 0x137   :  { %746 = vmatmul.mubr.msk.f32.vlgmr.msra.gmra.mrb[6].mxu1 %vm404_vm2, %v401_v50 }
 0x202   :  { %v474_v53 = vpop.f32.mrb[4].mxu1 }
 0x203   :  { %v475_v54 = vadd.f32 %v474_v53, %v403_v52  ;;  %v476_v55 = vpop.f32.mrb[5].mxu1 }
 0x204   :  { %v477_v56 = vadd.f32 %v476_v55, %v403_v52 }
 0x205   :  { %v661_v57 = vmul.f32 -1.442695, %v475_v54 }
 0x206   :  { %v662_v58 = vmul.f32 -1.442695, %v477_v56 }
 0x207   :  { %836 = vpow2.f32 %v661_v57 }
 0x208   :  { %838 = vpow2.f32 %v662_v58 }
 0x20a   :  { %v545_v59 = vpop.f32.mrb[6].mxu1 }
 0x20b   :  { %v546_v60 = vadd.f32 %v545_v59, %v403_v52  ;;  %v747_v61 = vpop.f32.mrb[7].mxu1 }
 0x20d   :  { %v663_v62 = vmul.f32 -1.442695, %v546_v60 }
 0x20f   :  { %840 = vpow2.f32 %v663_v62 }
 0x211   :  { %v837_v63 = vpop.eup %836 }
 0x212   :  { %v839_v0 = vpop.eup %838  ;;  %v558_v1 = vadd.f32 1.0, %v837_v63 }
 0x213   :  { %v559_v2 = vadd.f32 1.0, %v839_v0 }
 0x214   :  { %842 = vrcp.f32 %v558_v1 }
 0x215   :  { %844 = vrcp.f32 %v559_v2 }
 0x219   :  { %v841_v3 = vpop.eup %840 }
 0x21a   :  { %v560_v5 = vadd.f32 1.0, %v841_v3 }
 0x21c   :  { %846 = vrcp.f32 %v560_v5 }
 0x21e   :  { %v843_v8 = vpop.eup %842 }
 0x21f   :  { %v845_v9 = vpop.eup %844 }
 0x220   :  { %v570_v12 = vcombine.low %v843_v8, %v845_v9 }
 0x222   :  { %v577_v15 = vrot.slane %v570_v12, %v576_v13 }
 0x226   :  { %v847_v14 = vpop.eup %846 }
 0x227   :  { %v584_v16 = vrot.slane %v847_v14, %v576_v13 }
 0x229   :  { %v585_v17 = vcombine.low %v577_v15, %v584_v16 }
 0x22b   :  { %v592_v18 = vrot.slane %v585_v17, %v576_v13 }
 0x22d   :  { %598 = vst.msk [vmem:[#allocation3] sm:$0x7] %vm596_vm4, %v592_v18 }
 0x22e   :  { %859 = shalt.err (!%p856_p4)
}
 0x22f   :  { %s860_s14 = scalar_lea.hbm %s1136_s5, 48 }
 0x230   :  { %p861_p5 = scmp.ne.s32.totalorder %s1136_s5, %s860_s14  ;;  %p864_p6 = scmp.lt.u32.totalorder %s860_s14, %s1136_s5 }
 0x232   :  { %p866_p7 = pnand %p864_p6, %p861_p5 }
 0x234   :  { %869 = shalt.err (!%p866_p7)
}
 0x235   :  { %608 = dma.vmem_to_hbm [thread:$0]  %s606_s4, 48, %s1136_s5, [#allocation4]  }
 0x236   :  { %870 = dma.done.wait [#allocation4], 48  }
 0x237   :  { %871 = vsyncadd [#allocation4], 4294967248 }
 0x238   :  { %612 = vsyncpa [#allocation4], 1 }

</bundles_post_ra>
